<compile_context>
chip_gen: v5e
topology: v5e:2x2
jax: 0.10.0
libtpu: 0.0.40
codegen_flags: <defaults>
</compile_context>

<pallas_src>
import functools

import jax
import jax.numpy as jnp
from jax.experimental import pallas as pl
from jax.experimental.pallas import tpu as pltpu


_BIG = 1e30  # added to rowsum on padded i lanes -> softmax weight exactly 0


def _round_up(x: int, m: int) -> int:
    return (x + m - 1) // m * m


def _vmem_params():
    """Return (tile budget bytes, vmem_limit_bytes) derived from the chip."""
    try:
        cap = int(pltpu.get_tpu_info().vmem_capacity_bytes)
    except Exception:
        cap = 64 * 1024 * 1024  # conservative fallback (safe on every generation)
    # Leave headroom for Mosaic internal scratch / double buffers.
    vmem_limit = max(32 * 1024 * 1024,
                     min(cap - 16 * 1024 * 1024, 100 * 1024 * 1024))
    budget = int(vmem_limit * 0.6)
    return budget, vmem_limit


# --------------------------------------------------------------------------- #
# Prepass: rowsum[b, i] = (1/tau) * sum_{k < dim} |s[b,i] - s[b,k]|
# --------------------------------------------------------------------------- #
def _rowsum_kernel(scores_ref, rowsum_ref, *, dim: int, kc: int, inv_tau: float):
    tbr, dp = scores_ref.shape
    s = scores_ref[...]                       # (TBR, DP)
    s_col = s[:, :, None]                     # hoisted relayout: i -> sublanes

    nfull = dim // kc
    rem = dim - nfull * kc

    if nfull > 0:
        def body(c, acc):
            k0 = pl.multiple_of(c * kc, kc)
            sk = scores_ref[:, pl.ds(k0, kc)]                  # (TBR, KC)
            return acc + jnp.abs(s_col - sk[:, None, :])       # VALU only
        acc = jax.lax.fori_loop(0, nfull, body,
                                jnp.zeros((tbr, dp, kc), jnp.float32),
                                unroll=nfull <= 4)
        rowsum = jnp.sum(acc, axis=-1)        # single cross-lane (XLU) reduce
    else:
        rowsum = jnp.zeros((tbr, dp), jnp.float32)
    if rem:
        sk_tail = scores_ref[:, nfull * kc:nfull * kc + rem]   # static tail slice
        rowsum = rowsum + jnp.sum(jnp.abs(s_col - sk_tail[:, None, :]), axis=-1)

    rowsum = rowsum * inv_tau
    if dp != dim:                             # padded i lanes -> softmax weight 0
        lane = jax.lax.broadcasted_iota(jnp.int32, (tbr, dp), 1)
        rowsum = jnp.where(lane < dim, rowsum, _BIG)
    rowsum_ref[...] = rowsum


def _rowsum_pallas(scores_p, *, dim, inv_tau, budget, vmem_limit):
    bp, dp = scores_p.shape
    tbr = bp if bp < 8 else 8
    kc = min(dp, 128)
    while kc > 8 and 3 * tbr * dp * kc * 4 > min(budget, 12 * 1024 * 1024):
        kc //= 2
    kernel = functools.partial(_rowsum_kernel, dim=dim, kc=kc, inv_tau=inv_tau)
    return pl.pallas_call(
        kernel,
        out_shape=jax.ShapeDtypeStruct((bp, dp), jnp.float32),
        grid_spec=pltpu.PrefetchScalarGridSpec(
            num_scalar_prefetch=0,
            grid=(bp // tbr,),
            in_specs=[pl.BlockSpec((tbr, dp), lambda b: (b, 0))],
            out_specs=pl.BlockSpec((tbr, dp), lambda b: (b, 0)),
        ),
        compiler_params=pltpu.CompilerParams(
            dimension_semantics=("parallel",),
            vmem_limit_bytes=vmem_limit,
        ),
    )(scores_p)


# --------------------------------------------------------------------------- #
# Main kernel: logits[b, j, i] = s_i * scaling_j / tau - rowsum_i ; softmax_i
# --------------------------------------------------------------------------- #
def _neural_sort_kernel(scores_ref, rowsum_ref, out_ref, *, dim: int, inv_tau: float):
    tb, dp = scores_ref.shape
    tj = out_ref.shape[1]
    j_step = pl.program_id(1)

    s = scores_ref[...]          # (TB, DP): block index constant over j -> resident
    r = rowsum_ref[...]          # (TB, DP): includes 1/tau and +BIG on pad lanes

    j0 = (j_step * tj).astype(jnp.float32)
    jj = jax.lax.broadcasted_iota(jnp.float32, (tj, 1), 0)
    scaling = ((dim + 1.0) - 2.0 * (j0 + jj + 1.0)) * inv_tau        # (TJ, 1)

    logits = s[:, None, :] * scaling[None, :, :] - r[:, None, :]     # (TB, TJ, DP)
    m = jnp.max(logits, axis=-1, keepdims=True)
    e = jnp.exp(logits - m)
    denom = jnp.sum(e, axis=-1, keepdims=True)
    out_ref[...] = (e * pl.reciprocal(denom, approx=False)).astype(out_ref.dtype)


def _choose_tiles(batch: int, dim: int, dp: int, out_bytes: int, budget: int):
    """Pick (TB, TJ, JP, BP). TB is a multiple of 8 (or the full batch when
    batch <= 8); TJ is a multiple of 8 or the full extent; divisors preferred
    so no padding / wrapper slice is needed on well-shaped inputs."""

    def est(tb_, tj_):
        # double-buffered out block + ~3 f32 softmax temps + 2x2 input blocks
        return tb_ * tj_ * dp * (2 * out_bytes + 12) + 16 * tb_ * dp

    if batch <= 8:
        tb_cands = [batch]
    else:
        divs = [c for c in (64, 32, 16, 8) if c <= batch and batch % c == 0]
        rest = [c for c in (64, 32, 16, 8) if c <= batch and c not in divs]
        rest.sort(key=lambda c: (_round_up(batch, c) - batch, -c))  # least pad
        tb_cands = divs + rest

    def pick_tj(tb_):
        if est(tb_, dim) <= budget:                 # single full-extent j tile
            return dim, dim
        cands = [c for c in (1024, 512, 256, 128, 64, 32, 16, 8) if c < dim]
        for c in cands:                             # prefer tj | dim (jp == dim)
            if dim % c == 0 and est(tb_, c) <= budget:
                return c, dim
        for c in cands:
            if est(tb_, c) <= budget:
                return c, _round_up(dim, c)
        return None

    tb, res = tb_cands[-1], None
    for cand in tb_cands:                           # shrink TJ before TB
        r = pick_tj(cand)
        if r is not None:
            tb, res = cand, r
            break
    if res is None:                                 # last resort: smallest tiles
        tb = tb_cands[-1]
        res = (min(dim, 8), _round_up(dim, min(dim, 8)))
    tj, jp = res

    # Prefer >= 2 total grid steps so both TensorCores (v7x) can be used.
    bp = _round_up(batch, tb)
    if bp // tb == 1 and jp // tj == 1:
        if tb >= 16 and (tb // 2) % 8 == 0:
            tb //= 2
        elif tj >= 16 and tj % 16 == 0 and dim % (tj // 2) == 0:
            tj //= 2
        bp = _round_up(batch, tb)
    return tb, tj, jp, bp


def neural_sort(scores: jax.Array, tau: float = 1.0,
                out_dtype=jnp.bfloat16, return_padded: bool = False) -> jax.Array:
    """scores: (B, N) -> P_hat: (B, N, N), softmax over the last axis.

    out_dtype defaults to bfloat16 (halves the HBM write stream); pass
    jnp.float32 for exact parity with the PyTorch reference.  With
    return_padded=True the padded (BP, JP, DP) block is returned as-is (padded
    i lanes are exactly 0; padded j / batch rows are don't-care) to avoid any
    wrapper-side slice copy for odd shapes.
    """
    scores = jnp.asarray(scores, jnp.float32)
    batch, dim = scores.shape
    inv_tau = 1.0 / float(tau)
    dp = _round_up(max(dim, 128), 128)              # lane-dense last axis
    out_bytes = jnp.dtype(out_dtype).itemsize
    budget, vmem_limit = _vmem_params()
    tb, tj, jp, bp = _choose_tiles(batch, dim, dp, out_bytes, budget)

    scores_p = scores
    if (bp, dp) != (batch, dim):
        scores_p = jnp.pad(scores, ((0, bp - batch), (0, dp - dim)))

    rowsum_p = _rowsum_pallas(scores_p, dim=dim, inv_tau=inv_tau,
                              budget=budget, vmem_limit=vmem_limit)

    kernel = functools.partial(_neural_sort_kernel, dim=dim, inv_tau=inv_tau)
    out = pl.pallas_call(
        kernel,
        out_shape=jax.ShapeDtypeStruct((bp, jp, dp), out_dtype),
        grid_spec=pltpu.PrefetchScalarGridSpec(
            num_scalar_prefetch=0,
            grid=(bp // tb, jp // tj),
            in_specs=[pl.BlockSpec((tb, dp), lambda b, j: (b, 0)),
                      pl.BlockSpec((tb, dp), lambda b, j: (b, 0))],
            out_specs=pl.BlockSpec((tb, tj, dp), lambda b, j: (b, j, 0)),
        ),
        compiler_params=pltpu.CompilerParams(
            dimension_semantics=("parallel", "parallel"),
            vmem_limit_bytes=vmem_limit,
        ),
    )(scores_p, rowsum_p)

    if not return_padded and (bp, jp, dp) != (batch, dim, dim):
        out = out[:batch, :dim, :dim]
    return out


def _neural_sort_ref(scores: jax.Array, tau: float = 1.0) -> jax.Array:
    """Pure-JAX reference mirroring the PyTorch module line by line."""
    scores = scores.astype(jnp.float32)
    bsize, dim = scores.shape
    s = scores[:, :, None]                                        # (B, N, 1)
    one = jnp.ones((dim, 1), jnp.float32)
    A_scores = jnp.abs(s - jnp.transpose(s, (0, 2, 1)))           # (B, N, N)
    B = jnp.matmul(A_scores, jnp.matmul(one, one.T))              # (B, N, N)
    scaling = (dim + 1 - 2 * (jnp.arange(dim) + 1)).astype(jnp.float32)
    C = jnp.matmul(s, scaling[None, :])                           # (B, N, N)
    P_max = jnp.transpose(C - B, (0, 2, 1))
    return jax.nn.softmax(P_max / tau, axis=-1)


if __name__ == "__main__":
    key = jax.random.PRNGKey(0)
    k1, k2, k3 = jax.random.split(key, 3)

    # Primary small case (batch=2, seq=8): default bf16 output.
    scores = jax.random.normal(k1, (2, 8), dtype=jnp.float32)
    out = jax.block_until_ready(neural_sort(scores, tau=1.0))
    ref = _neural_sort_ref(scores, tau=1.0)
    assert out.shape == (2, 8, 8) and out.dtype == jnp.bfloat16
    assert jnp.allclose(out.astype(jnp.float32), ref, atol=1e-2, rtol=1e-2), \
        "bf16 mismatch vs reference"

    # Exact-parity f32 path on the same input.
    out_f32 = jax.block_until_ready(neural_sort(scores, tau=1.0,
                                                out_dtype=jnp.float32))
    assert jnp.allclose(out_f32, ref, atol=1e-5, rtol=1e-5), \
        "f32 mismatch vs reference"

    # Lane padding (N < 128), odd batch, tau != 1, f32 output.
    scores2 = jax.random.normal(k2, (5, 40), dtype=jnp.float32)
    out2 = jax.block_until_ready(neural_sort(scores2, tau=0.5,
                                             out_dtype=jnp.float32))
    ref2 = _neural_sort_ref(scores2, tau=0.5)
    assert out2.shape == (5, 40, 40)
    assert jnp.allclose(out2, ref2, atol=1e-5, rtol=1e-5), \
        "f32 padded-path mismatch vs reference"

    # 128-aligned fast path: no padding, no wrapper slice, multi-step grid.
    scores3 = jax.random.normal(k3, (16, 128), dtype=jnp.float32)
    out3 = jax.block_until_ready(neural_sort(scores3, tau=1.0))
    ref3 = _neural_sort_ref(scores3, tau=1.0)
    assert out3.shape == (16, 128, 128) and out3.dtype == jnp.bfloat16
    assert jnp.allclose(out3.astype(jnp.float32), ref3, atol=1e-2, rtol=1e-2), \
        "aligned-path mismatch vs reference"

    print("KERNEL_OK")
</pallas_src>

<mosaic_0001>
module attributes {stable_mosaic.version = 11 : i64} {
  func.func @_rowsum_kernel(%arg0: i32, %arg1: memref<2x128xf32, #tpu.memory_space<vmem>>, %arg2: memref<2x128xf32, #tpu.memory_space<vmem>>) attributes {dimension_semantics = [#tpu.dimension_semantics<parallel>], iteration_bounds = array<i64: 1>, scalar_prefetch = 0 : i64, scratch_operands = 0 : i64, tpu.core_type = #tpu.core_type<tc>, window_params = [{transform_indices = @transform_0, window_bounds = array<i64: 2, 128>}, {transform_indices = @transform_1, window_bounds = array<i64: 2, 128>}]} {
    %c0 = arith.constant 0 : index
    %c0_0 = arith.constant 0 : index
    %0 = vector.load %arg1[%c0, %c0_0] : memref<2x128xf32, #tpu.memory_space<vmem>>, vector<2x128xf32>
    %1 = vector.shape_cast %0 : vector<2x128xf32> to vector<2x128x1xf32>
    %cst = arith.constant 0.000000e+00 : f32
    %2 = vector.broadcast %cst : f32 to vector<2x128xf32>
    %c0_1 = arith.constant 0 : index
    %c0_2 = arith.constant 0 : index
    %3 = vector.load %arg1[%c0_1, %c0_2] : memref<2x128xf32, #tpu.memory_space<vmem>>, vector<2x8xf32>
    %4 = vector.shape_cast %3 : vector<2x8xf32> to vector<2x1x8xf32>
    %5 = vector.broadcast %1 : vector<2x128x1xf32> to vector<2x128x8xf32>
    %6 = vector.broadcast %4 : vector<2x1x8xf32> to vector<2x128x8xf32>
    %7 = arith.subf %5, %6 : vector<2x128x8xf32>
    %8 = math.absf %7 : vector<2x128x8xf32>
    %cst_3 = arith.constant dense<0.000000e+00> : vector<2x128xf32>
    %9 = vector.multi_reduction <add>, %8, %cst_3 [2] : vector<2x128x8xf32> to vector<2x128xf32>
    %10 = arith.addf %2, %9 : vector<2x128xf32>
    %cst_4 = arith.constant 1.000000e+00 : f32
    %11 = vector.broadcast %cst_4 : f32 to vector<2x128xf32>
    %12 = arith.mulf %10, %11 : vector<2x128xf32>
    %13 = tpu.iota {dimensions = array<i32: 1>} : vector<2x128xi32>
    %c8_i32 = arith.constant 8 : i32
    %14 = vector.broadcast %c8_i32 : i32 to vector<2x128xi32>
    %15 = arith.cmpi slt, %13, %14 : vector<2x128xi32>
    %cst_5 = arith.constant 1.000000e+30 : f32
    %16 = vector.broadcast %cst_5 : f32 to vector<2x128xf32>
    %17 = arith.select %15, %12, %16 : vector<2x128xi1>, vector<2x128xf32>
    %c0_6 = arith.constant 0 : index
    %c0_7 = arith.constant 0 : index
    %18 = vector.load %arg2[%c0_6, %c0_7] : memref<2x128xf32, #tpu.memory_space<vmem>>, vector<2x128xf32>
    tpu.vector_store %arg2[%c0_6, %c0_7], %17 {strides = array<i32>} : memref<2x128xf32, #tpu.memory_space<vmem>>, vector<2x128xf32>,
    return
  }
  func.func @transform_0(%arg0: i32) -> (i32, i32) {
    %c0_i32 = arith.constant 0 : i32
    %c0_i32_0 = arith.constant 0 : i32
    return %arg0, %c0_i32 : i32, i32
  }
  func.func @transform_1(%arg0: i32) -> (i32, i32) {
    %c0_i32 = arith.constant 0 : i32
    %c0_i32_0 = arith.constant 0 : i32
    return %arg0, %c0_i32 : i32, i32
  }
}

</mosaic_0001>

<bundles_post_ra>
// kernel: tpu_custom_call.1
= control target key start
LH: loop header
LB: loop body
LE: loop exit
PB: predicated region body
PF: predicated region fallthrough
CT: control target
= control target key end

     0   :  { %6 = vsyncpa [#allocation3], 0  ;;  %s893_s0 = inlined_call_operand.hbm [shape: f32[2,128], index: 0, kind: input, shape index: {}]   ;;  %s894_s1 = inlined_call_operand.hbm [shape: f32[2,128], index: 1, kind: output, shape index: {}]  }
   0x1   :  { %7 = vsyncpa [#allocation4], 0  ;;  %s13_s8 = sshll.u32 %s893_s0, 4  ;;  %s653_s9 = smov [#allocation2]   ;;  %s14_s8 = int_to_ptr.hbm [resolvable:$true] %s13_s8 }
   0x2   :  { %s15_s10 = sshll.u32 %s653_s9, 4  ;;  %s16_s10 = int_to_ptr.vmem [resolvable:$true] %s15_s10 }
   0x3   :  { %18 = dma.hbm_to_vmem [thread:$0]  %s14_s8, 32, %s16_s10, [#allocation3]  }
   0x4   :  { %649 = dma.done.wait [#allocation3], 32  }
   0x5   :  { %650 = vsyncadd [#allocation3], 4294967264  ;;  %v25_v0 = vlaneseq  ;;  %v669_v4 = vld [vmem:[#allocation2] sm:$0x3]  ;;  %vm288_vm0 = vcmask 64512   ;;  %vm455_vm1 = vcmask 130112  }
   0x6   :  { %v672_v5 = vperm.slane %v669_v4, 0  ;;  %v690_v17 = vperm.slane %v669_v4, 1  ;;  %v219_v43 = vrot.slane %v669_v4, 1  ;;  %vm459_vm2 = vcmask 195712   ;;  %s654_s0 = smov [#allocation5]   ;;  %s556_s14 = sshll.u32 %s894_s1, 4  ;;  %s557_s14 = int_to_ptr.hbm [resolvable:$true] %s556_s14 }
   0x7   :  { %v26_v1 = vshrl.u32 %v25_v0, 7  ;;  %vm463_vm3 = vcmask 261312   ;;  %vm467_vm4 = vcmask 326912   ;;  %vm471_vm5 = vcmask 392512   ;;  %s554_s11 = sshll.u32 %s654_s0, 4  ;;  %s555_s11 = int_to_ptr.vmem [resolvable:$true] %s554_s11 }
   0x8   :  { %v726_v44 = vperm.slane %v219_v43, 0  ;;  %vm475_vm6 = vcmask 458112   ;;  %vm479_vm7 = vcmask 523712   ;;  %vm483_vm8 = vcmask 589312  }
   0x9   :  { %568 = vset.pattern.permute.xlu0 %v26_v1  ;;  %v51_v2 = vadd.s32 32, %v26_v1  ;;  %v39_v3 = vadd.s32 16, %v26_v1  ;;  %v33_v6 = vadd.s32 8, %v26_v1  ;;  %v57_v7 = vadd.s32 40, %v26_v1 }
   0xa   :  { %v45_v8 = vadd.s32 24, %v26_v1  ;;  %v75_v9 = vadd.s32 64, %v26_v1  ;;  %v69_v10 = vadd.s32 56, %v26_v1  ;;  %v63_v11 = vadd.s32 48, %v26_v1 }
   0xb   :  { %572 = vset.pattern.permute.xlu2 %v51_v2  ;;  %570 = vset.pattern.permute.xlu1 %v39_v3  ;;  %v683_v12 = vadd.s32 104, %v26_v1  ;;  %v87_v13 = vadd.s32 80, %v26_v1  ;;  %v81_v14 = vadd.s32 72, %v26_v1  ;;  %v99_v15 = vadd.s32 96, %v26_v1 }
   0xc   :  { %v93_v16 = vadd.s32 88, %v26_v1  ;;  %v117_v18 = vadd.s32 120, %v26_v1  ;;  %v111_v19 = vadd.s32 112, %v26_v1  ;;  %vm487_vm9 = vcmask 654912  }
   0xd   :  { %vm491_vm10 = vcmask 720512   ;;  %vm495_vm11 = vcmask 786112   ;;  %vm499_vm12 = vcmask 851712   ;;  %vm503_vm13 = vcmask 917312  }
   0xe   :  { %vm507_vm14 = vcmask 982912   ;;  %vm511_vm15 = vcmask 1048512  }
  0x11   :  { %29 = vperm.xlu0 %568, %v672_v5  }
  0x13   :  { %53 = vperm.xlu2 %572, %v672_v5   ;;  %41 = vperm.xlu1 %570, %v672_v5  }
  0x19   :  { %569 = vset.pattern.permute.xlu0 %v33_v6 }
  0x1b   :  { %573 = vset.pattern.permute.xlu2 %v57_v7  ;;  %571 = vset.pattern.permute.xlu1 %v45_v8 }
  0x21   :  { %35 = vperm.xlu0 %569, %v672_v5  }
  0x23   :  { %59 = vperm.xlu2 %573, %v672_v5   ;;  %47 = vperm.xlu1 %571, %v672_v5  }
  0x29   :  { %576 = vset.pattern.permute.xlu0 %v75_v9 }
  0x2b   :  { %575 = vset.pattern.permute.xlu2 %v69_v10  ;;  %574 = vset.pattern.permute.xlu1 %v63_v11 }
  0x31   :  { %77 = vperm.xlu0 %576, %v672_v5  }
  0x33   :  { %71 = vperm.xlu2 %575, %v672_v5   ;;  %65 = vperm.xlu1 %574, %v672_v5  }
  0x39   :  { %581 = vset.pattern.permute.xlu0 %v683_v12 }
  0x3b   :  { %578 = vset.pattern.permute.xlu2 %v87_v13  ;;  %577 = vset.pattern.permute.xlu1 %v81_v14 }
  0x41   :  { %107 = vperm.xlu0 %581, %v672_v5  }
  0x43   :  { %89 = vperm.xlu2 %578, %v672_v5   ;;  %83 = vperm.xlu1 %577, %v672_v5  }
  0x49   :  { %586 = vset.pattern.permute.xlu0 %v39_v3 }
  0x4b   :  { %580 = vset.pattern.permute.xlu2 %v99_v15  ;;  %579 = vset.pattern.permute.xlu1 %v93_v16 }
  0x51   :  { %138 = vperm.xlu0 %586, %v690_v17  }
  0x53   :  { %101 = vperm.xlu2 %580, %v672_v5   ;;  %95 = vperm.xlu1 %579, %v672_v5  }
  0x59   :  { %591 = vset.pattern.permute.xlu0 %v69_v10 }
  0x5b   :  { %583 = vset.pattern.permute.xlu2 %v117_v18  ;;  %582 = vset.pattern.permute.xlu1 %v111_v19 }
  0x61   :  { %168 = vperm.xlu0 %591, %v690_v17  }
  0x63   :  { %119 = vperm.xlu2 %583, %v672_v5   ;;  %113 = vperm.xlu1 %582, %v672_v5  }
  0x69   :  { %596 = vset.pattern.permute.xlu0 %v99_v15 }
  0x6b   :  { %585 = vset.pattern.permute.xlu2 %v33_v6  ;;  %584 = vset.pattern.permute.xlu1 %v26_v1 }
  0x6d   :  { %v703_v21 = vpop.permute.xlu2 %53 }
  0x6e   :  { %v228_v59 = vsub.f32 %v703_v21, %v672_v5 }
  0x70   :  { %v260_v63 = vand.u32 2147483647, %v228_v59 }
  0x71   :  { %198 = vperm.xlu0 %596, %v690_v17  }
  0x72   :  { %v301_v4 = vsel %vm288_vm0, %v260_v63, 0.0 }
  0x73   :  { %132 = vperm.xlu2 %585, %v690_v17   ;;  %126 = vperm.xlu1 %584, %v690_v17  }
  0x79   :  { %600 = vset.pattern.permute.xlu0 %v117_v18 }
  0x7b   :  { %588 = vset.pattern.permute.xlu2 %v51_v2  ;;  %587 = vset.pattern.permute.xlu1 %v45_v8 }
  0x7d   :  { %v60_v25 = vpop.permute.xlu2 %59 }
  0x7e   :  { %v229_v27 = vsub.f32 %v60_v25, %v672_v5 }
  0x80   :  { %v261_v28 = vand.u32 2147483647, %v229_v27 }
  0x82   :  { %v304_v29 = vsel %vm288_vm0, %v261_v28, 0.0 }
  0x83   :  { %150 = vperm.xlu2 %588, %v690_v17   ;;  %144 = vperm.xlu1 %587, %v690_v17   ;;  %v30_v20 = vpop.permute.xlu0 %29 }
  0x84   :  { %v224_v51 = vsub.f32 %v30_v20, %v672_v5 }
  0x85   :  { %v42_v32 = vpop.permute.xlu1 %41 }
  0x86   :  { %v256_v52 = vand.u32 2147483647, %v224_v51  ;;  %v226_v61 = vsub.f32 %v42_v32, %v672_v5 }
  0x88   :  { %v289_v55 = vsel %vm288_vm0, %v256_v52, 0.0  ;;  %v258_v2 = vand.u32 2147483647, %v226_v61 }
  0x8b   :  { %590 = vset.pattern.permute.xlu2 %v63_v11  ;;  %589 = vset.pattern.permute.xlu1 %v57_v7  ;;  %v295_v7 = vsel %vm288_vm0, %v258_v2, 0.0 }
  0x8d   :  { %v72_v45 = vpop.permute.xlu2 %71 }
  0x8e   :  { %v231_v3 = vsub.f32 %v72_v45, %v672_v5 }
  0x93   :  { %162 = vperm.xlu2 %590, %v690_v17   ;;  %156 = vperm.xlu1 %589, %v690_v17   ;;  %v36_v22 = vpop.permute.xlu0 %35 }
  0x94   :  { %v225_v23 = vsub.f32 %v36_v22, %v672_v5 }
  0x95   :  { %v48_v35 = vpop.permute.xlu1 %47 }
  0x96   :  { %v257_v24 = vand.u32 2147483647, %v225_v23  ;;  %v227_v54 = vsub.f32 %v48_v35, %v672_v5 }
  0x98   :  { %v292_v26 = vsel %vm288_vm0, %v257_v24, 0.0  ;;  %v259_v57 = vand.u32 2147483647, %v227_v54 }
  0x9a   :  { %v298_v60 = vsel %vm288_vm0, %v259_v57, 0.0 }
  0x9b   :  { %593 = vset.pattern.permute.xlu2 %v81_v14  ;;  %592 = vset.pattern.permute.xlu1 %v75_v9  ;;  %v263_v9 = vand.u32 2147483647, %v231_v3 }
  0x9c   :  { %293 = vadd.xlane.f32.xlu0 %v292_v26 }
  0x9d   :  { %v90_v50 = vpop.permute.xlu2 %89 }
  0xa3   :  { %180 = vperm.xlu2 %593, %v690_v17   ;;  %174 = vperm.xlu1 %592, %v690_v17   ;;  %v78_v30 = vpop.permute.xlu0 %77 }
  0xa4   :  { %305 = vadd.xlane.f32.xlu0 %v304_v29  ;;  %v232_v31 = vsub.f32 %v78_v30, %v672_v5 }
  0xa5   :  { %v66_v36 = vpop.permute.xlu1 %65 }
  0xa6   :  { %v264_v33 = vand.u32 2147483647, %v232_v31  ;;  %v230_v6 = vsub.f32 %v66_v36, %v672_v5 }
  0xa8   :  { %v313_v34 = vsel %vm288_vm0, %v264_v33, 0.0  ;;  %v262_v11 = vand.u32 2147483647, %v230_v6 }
  0xaa   :  { %v307_v15 = vsel %vm288_vm0, %v262_v11, 0.0 }
  0xab   :  { %595 = vset.pattern.permute.xlu2 %v93_v16  ;;  %594 = vset.pattern.permute.xlu1 %v87_v13  ;;  %v310_v13 = vsel %vm288_vm0, %v263_v9, 0.0 }
  0xac   :  { %314 = vadd.xlane.f32.xlu0 %v313_v34 }
  0xad   :  { %v731_v53 = vpop.permute.xlu2 %101 }
  0xb3   :  { %192 = vperm.xlu2 %595, %v690_v17   ;;  %186 = vperm.xlu1 %594, %v690_v17   ;;  %v722_v42 = vpop.permute.xlu0 %107 }
  0xb4   :  { %v237_v54 = vsub.f32 %v722_v42, %v672_v5 }
  0xb5   :  { %v84_v37 = vpop.permute.xlu1 %83 }
  0xb6   :  { %v233_v14 = vsub.f32 %v84_v37, %v672_v5  ;;  %v269_v61 = vand.u32 2147483647, %v237_v54 }
  0xb8   :  { %v265_v20 = vand.u32 2147483647, %v233_v14  ;;  %v328_v6 = vsel %vm288_vm0, %v269_v61, 0.0 }
  0xba   :  { %v316_v26 = vsel %vm288_vm0, %v265_v20, 0.0 }
  0xbb   :  { %598 = vset.pattern.permute.xlu2 %v111_v19  ;;  %597 = vset.pattern.permute.xlu1 %v683_v12  ;;  %v234_v12 = vsub.f32 %v90_v50, %v672_v5 }
  0xbd   :  { %v737_v58 = vpop.permute.xlu2 %119 }
  0xc3   :  { %210 = vperm.xlu2 %598, %v690_v17   ;;  %204 = vperm.xlu1 %597, %v690_v17   ;;  %v139_v46 = vpop.permute.xlu0 %138 }
  0xc4   :  { %v242_v47 = vsub.f32 %v139_v46, %v726_v44 }
  0xc5   :  { %v96_v38 = vpop.permute.xlu1 %95 }
  0xc6   :  { %v235_v39 = vsub.f32 %v96_v38, %v672_v5  ;;  %v274_v48 = vand.u32 2147483647, %v242_v47 }
  0xc8   :  { %v267_v40 = vand.u32 2147483647, %v235_v39  ;;  %v343_v49 = vsel %vm288_vm0, %v274_v48, 0.0 }
  0xca   :  { %v322_v41 = vsel %vm288_vm0, %v267_v40, 0.0 }
  0xcb   :  { %599 = vset.pattern.permute.xlu1 %v117_v18  ;;  %323 = vadd.xlane.f32.xlu0 %v322_v41  ;;  %v266_v18 = vand.u32 2147483647, %v234_v12 }
  0xcd   :  { %v133_v1 = vpop.permute.xlu2 %132  ;;  %v319_v24 = vsel %vm288_vm0, %v266_v18, 0.0 }
  0xce   :  { %v241_v23 = vsub.f32 %v133_v1, %v726_v44 }
  0xd0   :  { %v273_v27 = vand.u32 2147483647, %v241_v23 }
  0xd2   :  { %v340_v31 = vsel %vm288_vm0, %v273_v27, 0.0 }
  0xd3   :  { %216 = vperm.xlu1 %599, %v690_v17   ;;  %344 = vadd.xlane.f32.xlu0 %v343_v49  ;;  %v169_v39 = vpop.permute.xlu0 %168 }
  0xd4   :  { %v247_v41 = vsub.f32 %v169_v39, %v726_v44 }
  0xd5   :  { %v735_v56 = vpop.permute.xlu1 %113 }
  0xd6   :  { %v279_v49 = vand.u32 2147483647, %v247_v41 }
  0xd8   :  { %v358_v52 = vsel %vm288_vm0, %v279_v49, 0.0 }
  0xdd   :  { %v151_v10 = vpop.permute.xlu2 %150 }
  0xde   :  { %v244_v30 = vsub.f32 %v151_v10, %v726_v44 }
  0xe0   :  { %v276_v36 = vand.u32 2147483647, %v244_v30 }
  0xe2   :  { %v349_v46 = vsel %vm288_vm0, %v276_v36, 0.0 }
  0xe3   :  { %v199_v2 = vpop.permute.xlu0 %198 }
  0xe5   :  { %v127_v62 = vpop.permute.xlu1 %126 }
  0xe6   :  { %v240_v25 = vsub.f32 %v127_v62, %v726_v44 }
  0xe8   :  { %v272_v29 = vand.u32 2147483647, %v240_v25 }
  0xea   :  { %v337_v33 = vsel %vm288_vm0, %v272_v29, 0.0 }
  0xec   :  { %290 = vadd.xlane.f32.xlu2 %v289_v55 }
  0xed   :  { %v163_v19 = vpop.permute.xlu2 %162 }
  0xee   :  { %v246_v47 = vsub.f32 %v163_v19, %v726_v44 }
  0xf0   :  { %v278_v51 = vand.u32 2147483647, %v246_v47 }
  0xf2   :  { %v355_v59 = vsel %vm288_vm0, %v278_v51, 0.0 }
  0xf4   :  { %299 = vadd.xlane.f32.xlu2 %v298_v60 }
  0xf5   :  { %v145_v8 = vpop.permute.xlu1 %144 }
  0xf6   :  { %v243_v32 = vsub.f32 %v145_v8, %v726_v44  ;;  %v236_v8 = vsub.f32 %v731_v53, %v672_v5 }
  0xf8   :  { %v275_v38 = vand.u32 2147483647, %v243_v32  ;;  %v268_v12 = vand.u32 2147483647, %v236_v8 }
  0xfa   :  { %v346_v48 = vsel %vm288_vm0, %v275_v38, 0.0 }
  0xfc   :  { %302 = vadd.xlane.f32.xlu2 %v301_v4  ;;  %v252_v4 = vsub.f32 %v199_v2, %v726_v44 }
  0xfd   :  { %296 = vadd.xlane.f32.xlu1 %v295_v7  ;;  %v181_v28 = vpop.permute.xlu2 %180 }
  0xfe   :  { %v249_v57 = vsub.f32 %v181_v28, %v726_v44  ;;  %v284_v10 = vand.u32 2147483647, %v252_v4  ;;  %v796_v28 = vand.u32 127, %v25_v0 }
 0x100   :  { %v281_v1 = vand.u32 2147483647, %v249_v57  ;;  %v815_v39 = vadd.s32 4294967256, %v796_v28  ;;  %v846_v4 = vadd.s32 4294967208, %v796_v28 }
 0x102   :  { %v364_v9 = vsel %vm288_vm0, %v281_v1, 0.0  ;;  %v839_v1 = vadd.s32 4294967224, %v796_v28 }
 0x104   :  { %311 = vadd.xlane.f32.xlu2 %v310_v13  ;;  %v373_v13 = vsel %vm288_vm0, %v284_v10, 0.0 }
 0x105   :  { %308 = vadd.xlane.f32.xlu1 %v307_v15  ;;  %v157_v16 = vpop.permute.xlu1 %156  ;;  %v238_v15 = vsub.f32 %v735_v56, %v672_v5 }
 0x106   :  { %v245_v17 = vsub.f32 %v157_v16, %v726_v44  ;;  %v325_v16 = vsel %vm288_vm0, %v268_v12, 0.0 }
 0x107   :  { %v270_v18 = vand.u32 2147483647, %v238_v15 }
 0x108   :  { %v277_v21 = vand.u32 2147483647, %v245_v17 }
 0x109   :  { %v331_v20 = vsel %vm288_vm0, %v270_v18, 0.0 }
 0x10a   :  { %v352_v22 = vsel %vm288_vm0, %v277_v21, 0.0  ;;  %v239_v21 = vsub.f32 %v737_v58, %v672_v5  ;;  %v799_v5 = vadd.s32 4294967288, %v796_v28 }
 0x10b   :  { %353 = vadd.xlane.f32.xlu0 %v352_v22 }
 0x10c   :  { %320 = vadd.xlane.f32.xlu2 %v319_v24  ;;  %v271_v56 = vand.u32 2147483647, %v239_v21 }
 0x10d   :  { %317 = vadd.xlane.f32.xlu1 %v316_v26  ;;  %v193_v37 = vpop.permute.xlu2 %192 }
 0x10e   :  { %v251_v43 = vsub.f32 %v193_v37, %v726_v44  ;;  %v334_v23 = vsel %vm288_vm0, %v271_v56, 0.0  ;;  %v812_v37 = vadd.s32 4294967264, %v796_v28 }
 0x10f   :  { %v294_v58 = vpop.xlane.xlu0 %293 }
 0x110   :  { %v283_v50 = vand.u32 2147483647, %v251_v43  ;;  %v454_v29 = vperm.slane %v294_v58, %v799_v5  ;;  %v497_v58 = vadd.s32 4294967200, %v796_v28 }
 0x112   :  { %v370_v55 = vsel %vm288_vm0, %v283_v50, 0.0  ;;  %v827_v50 = vadd.s32 4294967240, %v796_v28 }
 0x114   :  { %341 = vadd.xlane.f32.xlu2 %v340_v31 }
 0x115   :  { %338 = vadd.xlane.f32.xlu1 %v337_v33  ;;  %v175_v34 = vpop.permute.xlu1 %174 }
 0x116   :  { %v248_v35 = vsub.f32 %v175_v34, %v726_v44 }
 0x117   :  { %v306_v33 = vpop.xlane.xlu0 %305 }
 0x118   :  { %v280_v40 = vand.u32 2147483647, %v248_v35  ;;  %v809_v35 = vadd.s32 4294967280, %v796_v28 }
 0x11a   :  { %v361_v45 = vsel %vm288_vm0, %v280_v40, 0.0 }
 0x11b   :  { %362 = vadd.xlane.f32.xlu0 %v361_v45 }
 0x11c   :  { %350 = vadd.xlane.f32.xlu2 %v349_v46  ;;  %v470_v46 = vperm.slane %v306_v33, %v815_v39 }
 0x11d   :  { %347 = vadd.xlane.f32.xlu1 %v346_v48  ;;  %v211_v63 = vpop.permute.xlu2 %210  ;;  %v823_v48 = vadd.s32 4294967248, %v796_v28 }
 0x11e   :  { %v254_v42 = vsub.f32 %v211_v63, %v726_v44 }
 0x11f   :  { %v315_v36 = vpop.xlane.xlu0 %314 }
 0x120   :  { %v286_v11 = vand.u32 2147483647, %v254_v42 }
 0x122   :  { %v379_v14 = vsel %vm288_vm0, %v286_v11, 0.0 }
 0x123   :  { %371 = vadd.xlane.f32.xlu0 %v370_v55 }
 0x124   :  { %359 = vadd.xlane.f32.xlu2 %v358_v52  ;;  %v831_v52 = vadd.s32 4294967232, %v796_v28 }
 0x125   :  { %356 = vadd.xlane.f32.xlu1 %v355_v59  ;;  %v187_v60 = vpop.permute.xlu1 %186 }
 0x126   :  { %v250_v62 = vsub.f32 %v187_v60, %v726_v44  ;;  %v482_v61 = vperm.slane %v315_v36, %v831_v52 }
 0x128   :  { %v282_v3 = vand.u32 2147483647, %v250_v62 }
 0x12a   :  { %v367_v7 = vsel %vm288_vm0, %v282_v3, 0.0  ;;  %v843_v3 = vadd.s32 4294967216, %v796_v28 }
 0x12b   :  { %329 = vadd.xlane.f32.xlu0 %v328_v6 }
 0x12c   :  { %368 = vadd.xlane.f32.xlu2 %v367_v7 }
 0x12d   :  { %365 = vadd.xlane.f32.xlu1 %v364_v9 }
 0x133   :  { %380 = vadd.xlane.f32.xlu0 %v379_v14 }
 0x134   :  { %374 = vadd.xlane.f32.xlu2 %v373_v13 }
 0x135   :  { %326 = vadd.xlane.f32.xlu1 %v325_v16  ;;  %v205_v53 = vpop.permute.xlu1 %204 }
 0x136   :  { %v253_v17 = vsub.f32 %v205_v53, %v726_v44 }
 0x138   :  { %v285_v19 = vand.u32 2147483647, %v253_v17 }
 0x13a   :  { %v376_v22 = vsel %vm288_vm0, %v285_v19, 0.0 }
 0x13c   :  { %332 = vadd.xlane.f32.xlu2 %v331_v20 }
 0x13d   :  { %377 = vadd.xlane.f32.xlu1 %v376_v22 }
 0x13e   :  { %v324_v57 = vpop.xlane.xlu0 %323 }
 0x13f   :  { %v494_v10 = vperm.slane %v324_v57, %v846_v4 }
 0x145   :  { %335 = vadd.xlane.f32.xlu1 %v334_v23  ;;  %v217_v24 = vpop.permute.xlu1 %216 }
 0x146   :  { %v255_v25 = vsub.f32 %v217_v24, %v726_v44  ;;  %v805_v44 = vadd.s32 4294967272, %v796_v28  ;;  %v345_v7 = vpop.xlane.xlu0 %344 }
 0x148   :  { %v287_v26 = vand.u32 2147483647, %v255_v25  ;;  %v516_v25 = vperm.slane %v345_v7, %v809_v35 }
 0x14a   :  { %v382_v27 = vsel %vm288_vm0, %v287_v26, 0.0  ;;  %vm544_vm0 = vcmask 1041409  }
 0x14b   :  { %383 = vadd.xlane.f32.xlu2 %v382_v27 }
 0x15f   :  { %v291_v30 = vpop.xlane.xlu2 %290 }
 0x160   :  { %v452_v31 = vperm.slane %v291_v30, %v796_v28  ;;  %v501_v30 = vadd.s32 4294967192, %v796_v28 }
 0x162   :  { %v456_v32 = vsel %vm455_vm1, %v454_v29, %v452_v31 }
 0x167   :  { %v300_v34 = vpop.xlane.xlu2 %299 }
 0x168   :  { %v462_v0 = vperm.slane %v300_v34, %v805_v44 }
 0x16f   :  { %v303_v38 = vpop.xlane.xlu2 %302 }
 0x170   :  { %v297_v40 = vpop.xlane.xlu1 %296  ;;  %v466_v43 = vperm.slane %v303_v38, %v812_v37 }
 0x171   :  { %v458_v41 = vperm.slane %v297_v40, %v809_v35 }
 0x173   :  { %v460_v45 = vsel %vm459_vm2, %v458_v41, %v456_v32 }
 0x174   :  { %v464_v47 = vsel %vm463_vm3, %v462_v0, %v460_v45 }
 0x175   :  { %v468_v49 = vsel %vm467_vm4, %v466_v43, %v464_v47 }
 0x176   :  { %v472_v51 = vsel %vm471_vm5, %v470_v46, %v468_v49  ;;  %v505_v46 = vadd.s32 4294967184, %v796_v28 }
 0x177   :  { %v312_v54 = vpop.xlane.xlu2 %311 }
 0x178   :  { %v309_v55 = vpop.xlane.xlu1 %308  ;;  %v478_v60 = vperm.slane %v312_v54, %v827_v50 }
 0x179   :  { %v474_v59 = vperm.slane %v309_v55, %v823_v48 }
 0x17b   :  { %v476_v62 = vsel %vm475_vm6, %v474_v59, %v472_v51  ;;  %v509_v59 = vadd.s32 4294967176, %v796_v28 }
 0x17c   :  { %v480_v63 = vsel %vm479_vm7, %v478_v60, %v476_v62 }
 0x17d   :  { %v484_v2 = vsel %vm483_vm8, %v482_v61, %v480_v63 }
 0x17e   :  { %v354_v16 = vpop.xlane.xlu0 %353 }
 0x17f   :  { %v321_v42 = vpop.xlane.xlu2 %320  ;;  %v522_v38 = vperm.slane %v354_v16, %v815_v39 }
 0x180   :  { %v318_v6 = vpop.xlane.xlu1 %317  ;;  %v490_v9 = vperm.slane %v321_v42, %v843_v3 }
 0x181   :  { %v486_v8 = vperm.slane %v318_v6, %v839_v1 }
 0x183   :  { %v488_v11 = vsel %vm487_vm9, %v486_v8, %v484_v2 }
 0x184   :  { %v492_v12 = vsel %vm491_vm10, %v490_v9, %v488_v11 }
 0x185   :  { %v496_v13 = vsel %vm495_vm11, %v494_v10, %v492_v12 }
 0x187   :  { %v342_v14 = vpop.xlane.xlu2 %341 }
 0x188   :  { %v339_v15 = vpop.xlane.xlu1 %338  ;;  %v514_v22 = vperm.slane %v342_v14, %v799_v5 }
 0x189   :  { %v513_v56 = vperm.slane %v339_v15, %v796_v28 }
 0x18b   :  { %v515_v26 = vsel %vm455_vm1, %v514_v22, %v513_v56  ;;  %vm419_vm1 = vcmp.lt.s32.totalorder %v796_v28, 8 }
 0x18c   :  { %v517_v29 = vsel %vm459_vm2, %v516_v25, %v515_v26 }
 0x18e   :  { %v363_v18 = vpop.xlane.xlu0 %362 }
 0x18f   :  { %v351_v53 = vpop.xlane.xlu2 %350  ;;  %v528_v54 = vperm.slane %v363_v18, %v831_v52 }
 0x190   :  { %v348_v17 = vpop.xlane.xlu1 %347  ;;  %v520_v33 = vperm.slane %v351_v53, %v812_v37 }
 0x191   :  { %v518_v27 = vperm.slane %v348_v17, %v805_v44 }
 0x193   :  { %v519_v31 = vsel %vm463_vm3, %v518_v27, %v517_v29 }
 0x194   :  { %v521_v35 = vsel %vm467_vm4, %v520_v33, %v519_v31 }
 0x195   :  { %v523_v45 = vsel %vm471_vm5, %v522_v38, %v521_v35 }
 0x196   :  { %v372_v21 = vpop.xlane.xlu0 %371 }
 0x197   :  { %v360_v19 = vpop.xlane.xlu2 %359  ;;  %v534_v2 = vperm.slane %v372_v21, %v846_v4 }
 0x198   :  { %v357_v20 = vpop.xlane.xlu1 %356  ;;  %v526_v43 = vperm.slane %v360_v19, %v827_v50 }
 0x199   :  { %v524_v44 = vperm.slane %v357_v20, %v823_v48 }
 0x19b   :  { %v525_v37 = vsel %vm475_vm6, %v524_v44, %v523_v45 }
 0x19c   :  { %v527_v48 = vsel %vm479_vm7, %v526_v43, %v525_v37 }
 0x19d   :  { %v529_v50 = vsel %vm483_vm8, %v528_v54, %v527_v48 }
 0x19e   :  { %v330_v32 = vpop.xlane.xlu0 %329 }
 0x19f   :  { %v369_v23 = vpop.xlane.xlu2 %368  ;;  %v502_v36 = vperm.slane %v330_v32, %v501_v30 }
 0x1a0   :  { %v366_v24 = vpop.xlane.xlu1 %365  ;;  %v532_v60 = vperm.slane %v369_v23, %v843_v3 }
 0x1a1   :  { %v530_v39 = vperm.slane %v366_v24, %v839_v1 }
 0x1a3   :  { %v531_v57 = vsel %vm487_vm9, %v530_v39, %v529_v50 }
 0x1a4   :  { %v533_v61 = vsel %vm491_vm10, %v532_v60, %v531_v57 }
 0x1a5   :  { %v535_v6 = vsel %vm495_vm11, %v534_v2, %v533_v61 }
 0x1a6   :  { %v381_v52 = vpop.xlane.xlu0 %380 }
 0x1a7   :  { %v375_v5 = vpop.xlane.xlu2 %374  ;;  %v540_v10 = vperm.slane %v381_v52, %v505_v46 }
 0x1a8   :  { %v327_v34 = vpop.xlane.xlu1 %326  ;;  %v536_v62 = vperm.slane %v375_v5, %v497_v58 }
 0x1a9   :  { %v498_v0 = vperm.slane %v327_v34, %v497_v58 }
 0x1aa   :  { %v537_v8 = vsel %vm499_vm12, %v536_v62, %v535_v6 }
 0x1ab   :  { %v500_v40 = vsel %vm499_vm12, %v498_v0, %v496_v13 }
 0x1ac   :  { %v504_v41 = vsel %vm503_vm13, %v502_v36, %v500_v40 }
 0x1af   :  { %v333_v47 = vpop.xlane.xlu2 %332 }
 0x1b0   :  { %v506_v49 = vperm.slane %v333_v47, %v505_v46  ;;  %v378_v51 = vpop.xlane.xlu1 %377 }
 0x1b1   :  { %v538_v1 = vperm.slane %v378_v51, %v501_v30 }
 0x1b2   :  { %v508_v55 = vsel %vm507_vm14, %v506_v49, %v504_v41 }
 0x1b3   :  { %v539_v9 = vsel %vm503_vm13, %v538_v1, %v537_v8 }
 0x1b4   :  { %v541_v4 = vsel %vm507_vm14, %v540_v10, %v539_v9 }
 0x1b8   :  { %v336_v63 = vpop.xlane.xlu1 %335 }
 0x1b9   :  { %v510_v42 = vperm.slane %v336_v63, %v509_v59 }
 0x1bb   :  { %v512_v7 = vsel %vm511_vm15, %v510_v42, %v508_v55 }
 0x1be   :  { %v384_v3 = vpop.xlane.xlu2 %383 }
 0x1bf   :  { %v542_v11 = vperm.slane %v384_v3, %v509_v59 }
 0x1c1   :  { %v543_v12 = vsel %vm511_vm15, %v542_v11, %v541_v4 }
 0x1c2   :  { %v545_v13 = vsel %vm544_vm0, %v543_v12, %v512_v7 }
 0x1c3   :  { %v547_v14 = vsel %vm419_vm1, %v545_v13, 1e+30 }
 0x1c4   :  { %548 = vst [vmem:[#allocation5] sm:$0x3] %v547_v14 }
 0x1c5   :  { %559 = dma.vmem_to_hbm [thread:$0]  %s555_s11, 32, %s557_s14, [#allocation4]  }
 0x1c6   :  { %651 = dma.done.wait [#allocation4], 32  }
 0x1c7   :  { %652 = vsyncadd [#allocation4], 4294967264 }
 0x1c8   :  { %564 = vsyncpa [#allocation3], 1 }
 0x1c9   :  { %565 = vsyncpa [#allocation4], 1 }

</bundles_post_ra>
